<compile_context>
chip_gen: v5e
topology: v5e:2x2
jax: 0.10.0
libtpu: 0.0.40
codegen_flags: <defaults>
</compile_context>

<pallas_src>
import functools

import jax
import jax.numpy as jnp
import numpy as np
from jax.experimental import pallas as pl
from jax.experimental.pallas import tpu as pltpu


# ---------------------------------------------------------------------------
# Generation-aware configuration.
# ---------------------------------------------------------------------------
@functools.lru_cache(maxsize=None)
def _tpu_config():
    kind = ""
    try:
        kind = jax.devices()[0].device_kind.lower()
    except Exception:
        pass
    vmem_cap = 128 * 1024 * 1024
    try:
        info = pltpu.get_tpu_info()
        vmem_cap = int(getattr(info, "vmem_capacity_bytes", vmem_cap))
    except Exception:
        if "v7" in kind:
            vmem_cap = 64 * 1024 * 1024
    small_vmem = vmem_cap <= 64 * 1024 * 1024          # v7x-class
    bf16_eup = ("v6" in kind) or ("v7" in kind)        # bf16 exp path on EUP
    return dict(
        kind=kind,
        vmem_cap=vmem_cap,
        small_vmem=small_vmem,
        two_cores=("v7" in kind),
        # 96 MiB on 128-MiB chips (v5e/v6e), 48 MiB on 64-MiB chips (v7x).
        vmem_limit=int(min(vmem_cap * 3 // 4, 96 * 1024 * 1024)),
        exp_dtype=jnp.bfloat16 if bf16_eup else jnp.float32,
        # flash-attention seq-tile caps (shrunk by the VMEM budget loop below)
        flash_q_cap=512 if small_vmem else 1024,
        flash_kv_cap=256 if small_vmem else 512,
        # matmul tile caps (v6e/v7x MXU is 256x256; 128-multiples fine on v5e)
        mm_tm=256 if small_vmem else 512,
        mm_tn=256,
        mm_tk=256 if small_vmem else 512,
        # fc+LayerNorm row-tile cap (resident (tm, N) f32 working set)
        ln_tm=128 if small_vmem else 256,
        # weights up to this size are held fully resident in VMEM (no K/N grid)
        resident_w_bytes=(2 if small_vmem else 4) * 1024 * 1024,
    )


def _pick_tile(dim, cap, align=128):
    """Largest multiple of `align` <= cap that divides dim; else the full dim."""
    if dim <= align:
        return dim
    t = (min(cap, dim) // align) * align
    while t >= align:
        if dim % t == 0:
            return t
        t -= align
    return dim


# ---------------------------------------------------------------------------
# 1) Projection matmul kernels.
# ---------------------------------------------------------------------------
def _matmul_resident_kernel(x_ref, w_ref, o_ref):
    # Whole weight resident in VMEM: no K reduction loop, no accumulator scratch.
    o_ref[...] = jnp.dot(
        x_ref[...], w_ref[...], preferred_element_type=jnp.float32
    ).astype(o_ref.dtype)


def _matmul_kernel(x_ref, w_ref, o_ref, acc_ref):
    kk = pl.program_id(2)

    @pl.when(kk == 0)
    def _init():
        acc_ref[...] = jnp.zeros_like(acc_ref)

    acc_ref[...] += jnp.dot(
        x_ref[...], w_ref[...], preferred_element_type=jnp.float32
    )

    @pl.when(kk == pl.num_programs(2) - 1)
    def _store():
        o_ref[...] = acc_ref[...].astype(o_ref.dtype)


def pallas_matmul(x, w, *, out_dtype=jnp.bfloat16, cfg=None,
                  tm=None, tn=None, tk=None, force_general=False):
    """x: (M, K), w: (K, N) -> (M, N).  bf16 operands, f32 accumulation."""
    cfg = cfg or _tpu_config()
    M, K = x.shape
    K2, N = w.shape
    assert K == K2
    w_bytes = K * N * w.dtype.itemsize

    if (not force_general) and w_bytes <= cfg["resident_w_bytes"]:
        # Small/medium weight: keep it fully resident, grid only over M rows.
        tm_r = _pick_tile(M, tm or cfg["mm_tm"])
        assert M % tm_r == 0
        return pl.pallas_call(
            _matmul_resident_kernel,
            out_shape=jax.ShapeDtypeStruct((M, N), out_dtype),
            grid_spec=pltpu.PrefetchScalarGridSpec(
                num_scalar_prefetch=0,
                grid=(M // tm_r,),
                in_specs=[
                    pl.BlockSpec((tm_r, K), lambda i: (i, 0)),
                    pl.BlockSpec((K, N), lambda i: (0, 0)),
                ],
                out_specs=pl.BlockSpec((tm_r, N), lambda i: (i, 0)),
            ),
            compiler_params=pltpu.CompilerParams(
                dimension_semantics=("parallel",),
                vmem_limit_bytes=cfg["vmem_limit"],
            ),
        )(x, w)

    # General tiled matmul with K-reduction as the last ("arbitrary") grid axis.
    tm_g = _pick_tile(M, tm or cfg["mm_tm"])
    tn_g = _pick_tile(N, tn or cfg["mm_tn"])
    tk_g = _pick_tile(K, tk or cfg["mm_tk"])
    assert M % tm_g == 0 and N % tn_g == 0 and K % tk_g == 0
    return pl.pallas_call(
        _matmul_kernel,
        out_shape=jax.ShapeDtypeStruct((M, N), out_dtype),
        grid_spec=pltpu.PrefetchScalarGridSpec(
            num_scalar_prefetch=0,
            grid=(M // tm_g, N // tn_g, K // tk_g),
            in_specs=[
                pl.BlockSpec((tm_g, tk_g), lambda i, j, kk: (i, kk)),
                pl.BlockSpec((tk_g, tn_g), lambda i, j, kk: (kk, j)),
            ],
            out_specs=pl.BlockSpec((tm_g, tn_g), lambda i, j, kk: (i, j)),
            scratch_shapes=[pltpu.VMEM((tm_g, tn_g), jnp.float32)],
        ),
        compiler_params=pltpu.CompilerParams(
            dimension_semantics=("parallel", "parallel", "arbitrary"),
            vmem_limit_bytes=cfg["vmem_limit"],
        ),
    )(x, w)


# ---------------------------------------------------------------------------
# 2) Fused multi-head flash-attention kernel.
#    Grid: (batch, q_tiles, kv_tiles); heads handled inside the kernel via
#    static lane slices of the lane-dense (tile, H*d) refs.
# ---------------------------------------------------------------------------
def _mha_kernel(q_ref, k_ref, v_ref, o_ref, m_ref, l_ref, acc_ref,
                *, n_head, d_k, d_v, exp_dtype):
    ki = pl.program_id(2)

    @pl.when(ki == 0)
    def _init():
        m_ref[...] = jnp.full_like(m_ref, -jnp.inf)
        l_ref[...] = jnp.zeros_like(l_ref)
        acc_ref[...] = jnp.zeros_like(acc_ref)

    for h in range(n_head):  # static unroll: n_head is a small constant
        qs = slice(h * d_k, (h + 1) * d_k)
        vs = slice(h * d_v, (h + 1) * d_v)
        # Ref slices: only the d_k/d_v-wide head slab is loaded per iteration
        # (no full (tile, H*d) value materialization -> no vreg spill blowup).
        q_h = q_ref[:, qs]                  # (tq,  d_k) bf16
        k_h = k_ref[:, qs]                  # (tkv, d_k) bf16
        v_h = v_ref[:, vs]                  # (tkv, d_v) bf16

        # (tq, tkv) scores on the MXU with f32 accumulation; the 1/sqrt(d_k)
        # temperature is already folded into W_q.
        s = jax.lax.dot_general(
            q_h, k_h,
            dimension_numbers=(((1,), (1,)), ((), ())),
            preferred_element_type=jnp.float32,
        )

        m_prev = m_ref[:, h:h + 1]                              # (tq, 1) f32
        l_prev = l_ref[:, h:h + 1]
        m_new = jnp.maximum(m_prev, jnp.max(s, axis=1, keepdims=True))
        alpha = jnp.exp(m_prev - m_new)                         # tiny; keep f32
        # Exponentials on the EUP; bf16 path on v6e/v7x, f32 on v5e/older.
        p = jnp.exp((s - m_new).astype(exp_dtype))
        m_ref[:, h:h + 1] = m_new
        l_ref[:, h:h + 1] = alpha * l_prev + jnp.sum(
            p.astype(jnp.float32), axis=1, keepdims=True)

        pv = jnp.dot(p.astype(jnp.bfloat16), v_h,
                     preferred_element_type=jnp.float32)        # (tq, d_v)
        # Lane-dense f32 accumulator, updated in place per head slab.
        acc_ref[:, vs] = alpha * acc_ref[:, vs] + pv

    @pl.when(ki == pl.num_programs(2) - 1)
    def _finalize():
        # Deferred normalization (reciprocal on the otherwise idle EUP slot),
        # then one dense lane-wide (tq, H*d_v) store -- no masked vst per head.
        for h in range(n_head):
            vs = slice(h * d_v, (h + 1) * d_v)
            inv_l = pl.reciprocal(l_ref[:, h:h + 1], approx=True)
            acc_ref[:, vs] = acc_ref[:, vs] * inv_l
        o_ref[...] = acc_ref[...].astype(o_ref.dtype)


def _flash_vmem_bytes(tq, tkv, hdk, hdv):
    return (2 * tq * hdk * 2        # Q tile, double-buffered, bf16
            + 2 * tkv * hdk * 2     # K tile
            + 2 * tkv * hdv * 2     # V tile
            + 2 * tq * hdv * 2      # O tile
            + tq * hdv * 4          # f32 accumulator scratch
            + 2 * tq * 128 * 4      # m/l scratch (lane-padded to 128)
            + 2 * tq * tkv * 4)     # headroom for the f32 score tile / spills


def pallas_flash_mha(qp, kp, vp, *, n_head, d_k, d_v,
                     block_q=None, block_kv=None, out_dtype=jnp.bfloat16,
                     cfg=None):
    """qp: (B, Lq, H*d_k), kp: (B, Lk, H*d_k), vp: (B, Lk, H*d_v)."""
    cfg = cfg or _tpu_config()
    B, Lq, HDk = qp.shape
    _, Lk, _ = kp.shape
    HDv = n_head * d_v
    assert HDk == n_head * d_k and vp.shape[-1] == HDv

    tq = _pick_tile(Lq, block_q or cfg["flash_q_cap"])
    tkv = _pick_tile(Lk, block_kv or cfg["flash_kv_cap"])

    # Shrink tiles if the double-buffered working set would not fit the scoped
    # VMEM budget for this generation (most relevant on v7x's 64 MiB VMEM).
    budget = cfg["vmem_limit"] // 2
    for _ in range(16):
        if _flash_vmem_bytes(tq, tkv, HDk, HDv) <= budget:
            break
        ntq, ntkv = tq, tkv
        if tkv >= tq and tkv > 128:
            ntkv = _pick_tile(Lk, max(tkv // 2, 128))
        elif tq > 128:
            ntq = _pick_tile(Lq, max(tq // 2, 128))
        if (ntq, ntkv) == (tq, tkv):
            break
        tq, tkv = ntq, ntkv

    # v7x has 2 TensorCores: make sure the parallel grid has >= 2 blocks.
    if cfg["two_cores"] and B * (Lq // tq) < 2:
        t2 = _pick_tile(Lq, max(tq // 2, 128))
        if t2 < tq:
            tq = t2

    assert Lq % tq == 0 and Lk % tkv == 0

    kernel = functools.partial(_mha_kernel, n_head=n_head, d_k=d_k, d_v=d_v,
                               exp_dtype=cfg["exp_dtype"])
    return pl.pallas_call(
        kernel,
        out_shape=jax.ShapeDtypeStruct((B, Lq, HDv), out_dtype),
        grid_spec=pltpu.PrefetchScalarGridSpec(
            num_scalar_prefetch=0,
            grid=(B, Lq // tq, Lk // tkv),          # KV reduction axis last.
            in_specs=[
                pl.BlockSpec((None, tq, HDk), lambda b, qi, ki: (b, qi, 0)),
                pl.BlockSpec((None, tkv, HDk), lambda b, qi, ki: (b, ki, 0)),
                pl.BlockSpec((None, tkv, HDv), lambda b, qi, ki: (b, ki, 0)),
            ],
            # Output block resident across the KV axis (accumulator pattern),
            # lane-dense (all heads concatenated -> single dense writeback).
            out_specs=pl.BlockSpec((None, tq, HDv), lambda b, qi, ki: (b, qi, 0)),
            scratch_shapes=[
                pltpu.VMEM((tq, n_head), jnp.float32),   # running max m (heads on lanes)
                pltpu.VMEM((tq, n_head), jnp.float32),   # running sum l
                pltpu.VMEM((tq, HDv), jnp.float32),      # lane-dense accumulator
            ],
        ),
        compiler_params=pltpu.CompilerParams(
            dimension_semantics=("parallel", "parallel", "arbitrary"),
            vmem_limit_bytes=cfg["vmem_limit"],
        ),
    )(qp, kp, vp)


# ---------------------------------------------------------------------------
# 3) Fused fc (with bias) + residual add + LayerNorm kernel.
# ---------------------------------------------------------------------------
def _fc_ln_kernel(x_ref, w_ref, b_ref, res_ref, g_ref, bt_ref, o_ref, acc_ref,
                  *, eps):
    kk = pl.program_id(1)

    @pl.when(kk == 0)
    def _init():
        acc_ref[...] = jnp.zeros_like(acc_ref)

    acc_ref[...] += jnp.dot(
        x_ref[...], w_ref[...], preferred_element_type=jnp.float32
    )

    @pl.when(kk == pl.num_programs(1) - 1)
    def _finalize():
        y = acc_ref[...] + b_ref[...] + res_ref[...].astype(jnp.float32)
        mu = jnp.mean(y, axis=-1, keepdims=True)
        var = jnp.mean(jnp.square(y - mu), axis=-1, keepdims=True)
        y = (y - mu) * jax.lax.rsqrt(var + eps)
        o_ref[...] = (y * g_ref[...] + bt_ref[...]).astype(o_ref.dtype)


def pallas_fc_layernorm(x, w, b, residual, gamma, beta, *, eps=1e-5,
                        out_dtype=jnp.float32, cfg=None):
    """out = LayerNorm(x @ w + b + residual); x: (M, K), w: (K, N)."""
    cfg = cfg or _tpu_config()
    M, K = x.shape
    _, N = w.shape
    tm = _pick_tile(M, cfg["ln_tm"])
    tk = _pick_tile(K, cfg["mm_tk"])
    assert M % tm == 0 and K % tk == 0

    b2 = b.reshape(1, N).astype(jnp.float32)
    g2 = gamma.reshape(1, N).astype(jnp.float32)
    bt2 = beta.reshape(1, N).astype(jnp.float32)
    res = residual.astype(jnp.float32)

    kernel = functools.partial(_fc_ln_kernel, eps=eps)
    return pl.pallas_call(
        kernel,
        out_shape=jax.ShapeDtypeStruct((M, N), out_dtype),
        grid_spec=pltpu.PrefetchScalarGridSpec(
            num_scalar_prefetch=0,
            grid=(M // tm, K // tk),                # K-reduction last.
            in_specs=[
                pl.BlockSpec((tm, tk), lambda i, kk: (i, kk)),
                pl.BlockSpec((tk, N), lambda i, kk: (kk, 0)),
                pl.BlockSpec((1, N), lambda i, kk: (0, 0)),
                pl.BlockSpec((tm, N), lambda i, kk: (i, 0)),
                pl.BlockSpec((1, N), lambda i, kk: (0, 0)),
                pl.BlockSpec((1, N), lambda i, kk: (0, 0)),
            ],
            out_specs=pl.BlockSpec((tm, N), lambda i, kk: (i, 0)),
            scratch_shapes=[pltpu.VMEM((tm, N), jnp.float32)],
        ),
        compiler_params=pltpu.CompilerParams(
            dimension_semantics=("parallel", "arbitrary"),
            vmem_limit_bytes=cfg["vmem_limit"],
        ),
    )(x, w, b2, res, g2, bt2)


# ---------------------------------------------------------------------------
# Full MultiHeadAttention forward (eval mode).
# ---------------------------------------------------------------------------
def mha_forward(q, k, v, params, *, n_head, d_k, d_v, eps=1e-5,
                self_attention=None, block_q=None, block_kv=None, cfg=None):
    cfg = cfg or _tpu_config()
    B, Lq, d_model = q.shape
    _, Lk, _ = k.shape
    HDk, HDv = n_head * d_k, n_head * d_v
    temperature = float(np.sqrt(d_k))
    bf = jnp.bfloat16

    # Fold the 1/sqrt(d_k) score scaling into the Q projection weight.
    wq_scaled = params["w_q"] / temperature

    if self_attention is None:
        self_attention = (q is k) and (k is v)   # only reliable outside jit

    x_q = q.reshape(B * Lq, d_model).astype(bf)

    if self_attention:
        assert Lk == Lq
        # One pass over the activations / one kernel launch for Q, K and V.
        w_qkv = jnp.concatenate(
            [wq_scaled, params["w_k"], params["w_v"]], axis=1).astype(bf)
        qkv = pallas_matmul(x_q, w_qkv, cfg=cfg)
        qp = qkv[:, :HDk].reshape(B, Lq, HDk)
        kp = qkv[:, HDk:2 * HDk].reshape(B, Lk, HDk)
        vp = qkv[:, 2 * HDk:].reshape(B, Lk, HDv)
    else:
        x_k = k.reshape(B * Lk, d_model).astype(bf)
        x_v = v.reshape(B * Lk, d_model).astype(bf)
        qp = pallas_matmul(x_q, wq_scaled.astype(bf), cfg=cfg).reshape(B, Lq, HDk)
        kp = pallas_matmul(x_k, params["w_k"].astype(bf), cfg=cfg).reshape(B, Lk, HDk)
        vp = pallas_matmul(x_v, params["w_v"].astype(bf), cfg=cfg).reshape(B, Lk, HDv)

    # Fused flash attention; output layout (B, Lq, n_head*d_v) already matches
    # the PyTorch permute(1,2,0,3).view(sz_b, len_q, -1) head concatenation.
    attn_out = pallas_flash_mha(qp, kp, vp, n_head=n_head, d_k=d_k, d_v=d_v,
                                block_q=block_q, block_kv=block_kv, cfg=cfg)

    # fc + bias + dropout(identity) + residual + LayerNorm, fused.
    out = pallas_fc_layernorm(
        attn_out.reshape(B * Lq, HDv),
        params["w_o"].astype(bf),
        params["b_o"],
        q.reshape(B * Lq, d_model),
        params["gamma"], params["beta"],
        eps=eps, cfg=cfg)
    return out.reshape(B, Lq, d_model)


# ---------------------------------------------------------------------------
# Pure-JAX reference (same precision chain: bf16 matmuls, f32 softmax / LN).
# ---------------------------------------------------------------------------
def mha_reference(q, k, v, params, *, n_head, d_k, d_v, eps=1e-5):
    B, Lq, d_model = q.shape
    _, Lk, _ = k.shape
    bf = jnp.bfloat16
    temp = float(np.sqrt(d_k))

    def mm(a, b):
        return jnp.dot(a.astype(bf), b.astype(bf),
                       preferred_element_type=jnp.float32)

    qp = mm(q.reshape(-1, d_model), params["w_q"] / temp).astype(bf)
    kp = mm(k.reshape(-1, d_model), params["w_k"]).astype(bf)
    vp = mm(v.reshape(-1, d_model), params["w_v"]).astype(bf)
    qp = qp.reshape(B, Lq, n_head, d_k)
    kp = kp.reshape(B, Lk, n_head, d_k)
    vp = vp.reshape(B, Lk, n_head, d_v)

    s = jnp.einsum("bqhd,bkhd->bhqk", qp, kp,
                   preferred_element_type=jnp.float32)
    p = jax.nn.softmax(s, axis=-1)
    o = jnp.einsum("bhqk,bkhd->bqhd", p.astype(bf), vp,
                   preferred_element_type=jnp.float32)
    o = o.astype(bf).reshape(B * Lq, n_head * d_v)

    y = mm(o, params["w_o"]) + params["b_o"] + q.reshape(B * Lq, d_model)
    mu = jnp.mean(y, axis=-1, keepdims=True)
    var = jnp.mean(jnp.square(y - mu), axis=-1, keepdims=True)
    y = (y - mu) * jax.lax.rsqrt(var + eps)
    y = y * params["gamma"] + params["beta"]
    return y.reshape(B, Lq, d_model)


if __name__ == "__main__":
    cfg = _tpu_config()

    # Small, TPU-friendly shapes consistent with the module.
    B, L, d_model = 2, 128, 128
    n_head, d_k, d_v = 2, 64, 64

    key = jax.random.PRNGKey(0)
    ks = jax.random.split(key, 12)

    params = {
        "w_q": jax.random.normal(ks[3], (d_model, n_head * d_k), jnp.float32)
        * np.sqrt(2.0 / (d_model + d_k)),
        "w_k": jax.random.normal(ks[4], (d_model, n_head * d_k), jnp.float32)
        * np.sqrt(2.0 / (d_model + d_k)),
        "w_v": jax.random.normal(ks[5], (d_model, n_head * d_v), jnp.float32)
        * np.sqrt(2.0 / (d_model + d_v)),
        "w_o": jax.random.normal(ks[6], (n_head * d_v, d_model), jnp.float32)
        * np.sqrt(2.0 / (n_head * d_v + d_model)),
        "b_o": 0.02 * jax.random.normal(ks[7], (d_model,), jnp.float32),
        "gamma": jnp.ones((d_model,), jnp.float32),
        "beta": jnp.zeros((d_model,), jnp.float32),
    }

    # (a) Micro-check of the general K-reduction matmul path (not hit by the
    #     small demo shapes otherwise, since their weights are VMEM-resident).
    a = jax.random.normal(ks[8], (256, 256), jnp.float32).astype(jnp.bfloat16)
    wg = jax.random.normal(ks[9], (256, 256), jnp.float32).astype(jnp.bfloat16)
    got = pallas_matmul(a, wg, out_dtype=jnp.float32, cfg=cfg,
                        force_general=True, tm=128, tn=128, tk=128)
    want = jnp.dot(a, wg, preferred_element_type=jnp.float32)
    np.testing.assert_allclose(np.asarray(got), np.asarray(want),
                               atol=1e-2, rtol=1e-2)

    # (b) Self-attention (fused QKV projection path).
    x = jax.random.normal(ks[0], (B, L, d_model), jnp.float32)
    fwd_self = jax.jit(functools.partial(
        mha_forward, n_head=n_head, d_k=d_k, d_v=d_v, self_attention=True))
    out_self = jax.block_until_ready(fwd_self(x, x, x, params))
    ref_self = mha_reference(x, x, x, params, n_head=n_head, d_k=d_k, d_v=d_v)
    np.testing.assert_allclose(np.asarray(out_self, dtype=np.float32),
                               np.asarray(ref_self, dtype=np.float32),
                               atol=5e-2, rtol=5e-2)

    # (c) Cross-attention with Lk != Lq and a forced 2-step online softmax
    #     (block_kv=128 over Lk=256) to exercise the rescale path.
    Lk = 256
    q = jax.random.normal(ks[1], (B, L, d_model), jnp.float32)
    k = jax.random.normal(ks[2], (B, Lk, d_model), jnp.float32)
    v = jax.random.normal(ks[10], (B, Lk, d_model), jnp.float32)
    fwd_cross = jax.jit(functools.partial(
        mha_forward, n_head=n_head, d_k=d_k, d_v=d_v,
        self_attention=False, block_kv=128))
    out_cross = jax.block_until_ready(fwd_cross(q, k, v, params))
    ref_cross = mha_reference(q, k, v, params, n_head=n_head, d_k=d_k, d_v=d_v)
    np.testing.assert_allclose(np.asarray(out_cross, dtype=np.float32),
                               np.asarray(ref_cross, dtype=np.float32),
                               atol=5e-2, rtol=5e-2)

    print("KERNEL_OK")
</pallas_src>

<mosaic_0001>
module attributes {stable_mosaic.version = 11 : i64} {
  func.func @_matmul_kernel(%arg0: i32, %arg1: i32, %arg2: i32, %arg3: memref<128x128xbf16, #tpu.memory_space<vmem>>, %arg4: memref<128x128xbf16, #tpu.memory_space<vmem>>, %arg5: memref<128x128xf32, #tpu.memory_space<vmem>>, %arg6: memref<128x128xf32, #tpu.memory_space<vmem>>) attributes {dimension_semantics = [#tpu.dimension_semantics<parallel>, #tpu.dimension_semantics<parallel>, #tpu.dimension_semantics<arbitrary>], iteration_bounds = array<i64: 2, 2, 2>, scalar_prefetch = 0 : i64, scratch_operands = 1 : i64, tpu.core_type = #tpu.core_type<tc>, window_params = [{transform_indices = @transform_0, window_bounds = array<i64: 128, 128>}, {transform_indices = @transform_1, window_bounds = array<i64: 128, 128>}, {transform_indices = @transform_2, window_bounds = array<i64: 128, 128>}]} {
    %c0_i32 = arith.constant 0 : i32
    %0 = arith.cmpi eq, %arg2, %c0_i32 : i32
    %1 = arith.extui %0 : i1 to i32
    %c0_i32_0 = arith.constant 0 : i32
    %2 = arith.cmpi ne, %1, %c0_i32_0 : i32
    scf.if %2 {
      %cst_9 = arith.constant 0.000000e+00 : f32
      %12 = vector.broadcast %cst_9 : f32 to vector<128x128xf32>
      %c0_10 = arith.constant 0 : index
      %c0_11 = arith.constant 0 : index
      %13 = vector.load %arg6[%c0_10, %c0_11] : memref<128x128xf32, #tpu.memory_space<vmem>>, vector<128x128xf32>
      tpu.vector_store %arg6[%c0_10, %c0_11], %12 {strides = array<i32>} : memref<128x128xf32, #tpu.memory_space<vmem>>, vector<128x128xf32>,
    } else {
    }
    %c0 = arith.constant 0 : index
    %c0_1 = arith.constant 0 : index
    %3 = vector.load %arg6[%c0, %c0_1] : memref<128x128xf32, #tpu.memory_space<vmem>>, vector<128x128xf32>
    %c0_2 = arith.constant 0 : index
    %c0_3 = arith.constant 0 : index
    %4 = vector.load %arg3[%c0_2, %c0_3] : memref<128x128xbf16, #tpu.memory_space<vmem>>, vector<128x128xbf16>
    %c0_4 = arith.constant 0 : index
    %c0_5 = arith.constant 0 : index
    %5 = vector.load %arg4[%c0_4, %c0_5] : memref<128x128xbf16, #tpu.memory_space<vmem>>, vector<128x128xbf16>
    %cst = arith.constant dense<0.000000e+00> : vector<128x128xf32>
    %6 = tpu.matmul %4, %5, %cst {dimension_numbers = #tpu.dot_dimension_numbers<[1], [0], [0], [1], [0, 0, 1, 1], [], []>} : vector<128x128xbf16>, vector<128x128xbf16>, vector<128x128xf32> -> vector<128x128xf32>
    %7 = arith.addf %3, %6 : vector<128x128xf32>
    %c0_6 = arith.constant 0 : index
    %c0_7 = arith.constant 0 : index
    %8 = vector.load %arg6[%c0_6, %c0_7] : memref<128x128xf32, #tpu.memory_space<vmem>>, vector<128x128xf32>
    tpu.vector_store %arg6[%c0_6, %c0_7], %7 {strides = array<i32>} : memref<128x128xf32, #tpu.memory_space<vmem>>, vector<128x128xf32>,
    %c1_i32 = arith.constant 1 : i32
    %9 = arith.cmpi eq, %arg2, %c1_i32 : i32
    %10 = arith.extui %9 : i1 to i32
    %c0_i32_8 = arith.constant 0 : i32
    %11 = arith.cmpi ne, %10, %c0_i32_8 : i32
    scf.if %11 {
      %c0_9 = arith.constant 0 : index
      %c0_10 = arith.constant 0 : index
      %12 = vector.load %arg6[%c0_9, %c0_10] : memref<128x128xf32, #tpu.memory_space<vmem>>, vector<128x128xf32>
      %c0_11 = arith.constant 0 : index
      %c0_12 = arith.constant 0 : index
      %13 = vector.load %arg5[%c0_11, %c0_12] : memref<128x128xf32, #tpu.memory_space<vmem>>, vector<128x128xf32>
      tpu.vector_store %arg5[%c0_11, %c0_12], %12 {strides = array<i32>} : memref<128x128xf32, #tpu.memory_space<vmem>>, vector<128x128xf32>,
    } else {
    }
    return
  }
  func.func @transform_0(%arg0: i32, %arg1: i32, %arg2: i32) -> (i32, i32) {
    %c0_i32 = arith.constant 0 : i32
    return %arg0, %arg2 : i32, i32
  }
  func.func @transform_1(%arg0: i32, %arg1: i32, %arg2: i32) -> (i32, i32) {
    %c0_i32 = arith.constant 0 : i32
    return %arg2, %arg1 : i32, i32
  }
  func.func @transform_2(%arg0: i32, %arg1: i32, %arg2: i32) -> (i32, i32) {
    %c0_i32 = arith.constant 0 : i32
    return %arg0, %arg1 : i32, i32
  }
}

</mosaic_0001>

<bundles_post_ra>
// kernel: tpu_custom_call.1
= control target key start
LH: loop header
LB: loop body
LE: loop exit
PB: predicated region body
PF: predicated region fallthrough
CT: control target
= control target key end

     0   :  { %s1534_s0 = inlined_call_operand.hbm [shape: bf16[256,256], index: 0, kind: input, shape index: {}]   ;;  %s1535_s1 = inlined_call_operand.hbm [shape: bf16[256,256], index: 1, kind: input, shape index: {}]   ;;  %s1536_s2 = inlined_call_operand.hbm [shape: f32[256,256], index: 2, kind: output, shape index: {}]  }
   0x1   :  { %1548 = sst [smem:[#allocation23_spill]] %s1534_s0 }
   0x2   :  { %1549 = sst [smem:[#allocation24_spill]] %s1536_s2 }
   0x3   :  { %7 = vsyncpa [#allocation4], 0 }
   0x4   :  { %9 = vsyncpa [#allocation4 + $0x1], 0 }
   0x5   :  { %10 = vsyncpa [#allocation7], 0 }
   0x6   :  { %12 = vsyncpa [#allocation7 + $0x1], 0 }
   0x7   :  { %13 = vsyncpa [#allocation5], 0 }
   0x8   :  { %15 = vsyncpa [#allocation5 + $0x1], 0  ;;  %s1191_s9 = smov 0   ;;  %s1193_s10 = smov 0  }
   0x9   :  { %s1195_s11 = smov 0   ;;  %s1197_s12 = smov 0  }
   0xa   :  { %s1199_s13 = smov 0   ;;  %s1201_s14 = smov 0  }
   0xb   :  { %s1203_s15 = smov 0   ;;  %s1205_s16 = smov 0  }
   0xc   :  { %s1207_s17 = smov 0   ;;  %s1209_s18 = smov 0  }
   0xd   :  { %s1211_s19 = smov 0   ;;  %s1213_s20 = smov 0  }
   0xe   :  { %s1215_s21 = smov 0   ;;  %s1217_s22 = smov 0  }
   0xf   :  { %s1219_s23 = smov 0   ;;  %s1221_s24 = smov 0  }
  0x10 LB: > { %1550 = sst [smem:[#allocation12_spill]] %s1139_s17  ;;  %s656_s25 = sadd.s32 4294967295, %s1167_s24   ;;  %s1167_s24 = sphi %s1221_s24, %s21_s24   ;;  %s1163_s23 = sphi %s1219_s23, %s1590_s23   ;;  %s1159_s22 = sphi %s1217_s22, %s1603_s22   ;;  %s1155_s21 = sphi %s1215_s21, %s1602_s21   ;;  %s1151_s20 = sphi %s1213_s20, %s1601_s20   ;;  %s1147_s19 = sphi %s1211_s19, %s1600_s19   ;;  %s1143_s18 = sphi %s1209_s18, %s1599_s18   ;;  %s1139_s17 = sphi %s1207_s17, %s1586_s17   ;;  %s1135_s16 = sphi %s1205_s16, %s1598_s16   ;;  %s1131_s15 = sphi %s1203_s15, %s1597_s15   ;;  %s1127_s14 = sphi %s1201_s14, %s1596_s14   ;;  %s1123_s13 = sphi %s1199_s13, %s1595_s13   ;;  %s1119_s12 = sphi %s1197_s12, %s1594_s12   ;;  %s1115_s11 = sphi %s1195_s11, %s1593_s11   ;;  %s1111_s10 = sphi %s1193_s10, %s1592_s10   ;;  %s1107_s9 = sphi %s1191_s9, %s1591_s9  }
  0x11   : > { %1551 = sst [smem:[#allocation13_spill]] %s1143_s18  ;;  %s33_s26 = sadd.s32 1, %s1155_s21 }
  0x12   : > { %1552 = sst [smem:[#allocation14_spill]] %s1147_s19  ;;  %p1271_p0 = scmp.ge.s32.totalorder %s33_s26, 2 }
  0x13   : > { %1553 = sst [smem:[#allocation15_spill]] %s1151_s20  ;;  %p56_p1 = scmp.ne.s32.totalorder %s1139_s17, %s1135_s16 }
  0x14   : > { %1554 = sst [smem:[#allocation16_spill]] %s1163_s23  ;;  %s1605_s26 = smov (%p1271_p0, %s33_s26), 0 }
  0x15   : > { %1556 = sst [smem:[#allocation17_spill]] %s1605_s26  ;;  %p57_p2 = scmp.eq.s32.totalorder %s1167_s24, 0 }
  0x16   : > { %p62_p3 = scmp.ne.s32.totalorder %s1135_s16, %s1131_s15  ;;  %s1287_s30 = ssub.s32 %s1155_s21, %s1605_s26 }
  0x17   : > { %p1289_p4 = scmp.eq.s32.totalorder %s656_s25, 0  ;;  %p1295_p5 = por %p57_p2, %p56_p1 }
  0x18   : > { %p1299_p6 = scmp.eq.s32.totalorder %s656_s25, 7  ;;  %p804_p8 = scmp.lt.s32.totalorder %s1167_s24, 8 }
  0x19   : > { %p1305_p7 = por %p1289_p4, %p62_p3  ;;  %s142_s7 = sand.u32 1, %s1139_s17  }
  0x1a   : > { %s660_s8 = sshll.u32 %s142_s7, 6  ;;  %s744_s15 = sshll.u32 %s1163_s23, 5 }
  0x1b   : > { %s151_s29 = sadd.s32 %s1155_s21, %s744_s15  ;;  %s146_s28 = scalar_lea.vmem [#allocation3], %s660_s8 }
  0x1c   : > { %s156_s26 = sshll.u32 %s146_s28, 4  ;;  %s663_s25 = sshll.u32 %s151_s29, 2  ;;  %s157_s26 = int_to_ptr.vmem [resolvable:$true] %s156_s26 }
  0x1d   : > { %s1561_s0 = sld [smem:[#allocation23_spill]]  ;;  %p794_p9 = pnand %p804_p8, %p1295_p5 }
  0x1e   : > { %s143_s28 = scalar_lea.sflag [#allocation4], %s142_s7  ;;  %s1539_s29 = smov 128  }
  0x1f   : > { %s1540_s15 = smov 64   ;;  %s1541_s18 = smov 4  }
  0x20   : > { %p668_p10 = scmp.ge.s32.totalorder %s1167_s24, 1  ;;  %p188_p11 = scmp.lt.s32.totalorder %s1167_s24, 9 }
  0x21   : > { %s657_s19 = sadd.s32 4294967294, %s1167_s24   ;;  %s77_s4 = sadd.s32 1, %s1127_s14 }
  0x22   : > { %p1325_p12 = pnand %p668_p10, %p188_p11  ;;  %p84_p13 = scmp.ne.s32.totalorder %s1127_s14, %s1123_s13 }
  0x23   : > { %s153_s20 = scalar_lea.hbm %s1561_s0, %s663_s25  ;;  %p90_p1 = scmp.ne.s32.totalorder %s1123_s13, %s1119_s12 }
  0x24   : > { %s154_s8 = sshll.u32 %s153_s20, 4  ;;  %s36_s20 = sadd.s32 1, %s1159_s22  ;;  %s155_s8 = int_to_ptr.hbm [resolvable:$true] %s154_s8 }
  0x25   : > { %796 = dma.hbm_to_vmem [thread:$0]  (!%p794_p9), %s155_s8, 1024, %s157_s26, %s143_s28, %s1539_s29, %s1540_s15, %s1541_s18  }
  0x26   : > { %s1607_s20 = smov (!%p1271_p0, %s36_s20), %s1159_s22  ;;  %s105_s26 = sadd.s32 1, %s1115_s11 }
  0x27   : > { %p38_p3 = scmp.ge.s32.totalorder %s1607_s20, 2  ;;  %p1342_p5 = por %p84_p13, %p57_p2 }
  0x28   : > { %p1348_p9 = por %p90_p1, %p1289_p4  ;;  %s1566_s27 = sadd.s32 1, %s1163_s23 }
  0x29   : > { %s1609_s20 = smov (%p38_p3, %s1607_s20), 0  ;;  %s1611_s27 = smov (!%p38_p3, %s1566_s27), %s1163_s23 }
  0x2a   : > { %1565 = sst [smem:[#allocation18_spill]] %s1609_s20  ;;  %s73_s12 = ssub.s32 %s1159_s22, %s1609_s20 }
  0x2b   : > { %p115_p0 = scmp.ne.s32.totalorder %s1115_s11, %s1111_s10  ;;  %p42_p2 = scmp.ge.s32.totalorder %s1611_s27, 2 }
  0x2c   : > { %s74_s8 = sor.u32 %s73_s12, %s1287_s30  ;;  %p121_p11 = scmp.ne.s32.totalorder %s1111_s10, %s1107_s9 }
  0x2d   : > { %p75_p10 = scmp.eq.s32.totalorder %s74_s8, 0  ;;  %p1364_p4 = por %p1299_p6, %p115_p0 }
  0x2e   : > { %s1613_s27 = smov (%p42_p2, %s1611_s27), 0  ;;  %p122_p3 = scmp.eq.s32.totalorder %s657_s19, 7 }
  0x2f   : > { %s1567_s3 = scalar_select %p1364_p4, 1, 0 }
  0x30   : > { %1569 = sst [smem:[#allocation20_spill]] %s1613_s27  ;;  %s44_s29 = ssub.s32 %s1163_s23, %s1613_s27 }
  0x31   : > { %1568 = sst [smem:[#allocation19_spill]] %s1567_s3  ;;  %s46_s15 = sor.u32 %s1287_s30, %s44_s29 }
  0x32   : > { %s1371_s28 = scalar_select %p75_p10, %s1127_s14, %s77_s4  }
  0x33   : > { %s102_s18 = sor.u32 %s73_s12, %s44_s29  ;;  %p47_p13 = scmp.eq.s32.totalorder %s46_s15, 0 }
  0x34   : > { %1570 = sst [smem:[#allocation21_spill]] %s1371_s28  ;;  %p103_p1 = scmp.eq.s32.totalorder %s102_s18, 0 }
  0x35   : > { %s166_s5 = sand.u32 1, %s1127_s14   ;;  %s1571_s8 = sadd.s32 1, %s1139_s17 }
  0x36   : > { %s1382_s0 = scalar_select %p47_p13, %s1139_s17, %s1571_s8  }
  0x37   : > { %s1385_s20 = scalar_select %p103_p1, %s1115_s11, %s105_s26  }
  0x38   : > { %1572 = sst [smem:[#allocation22_spill]] %s1382_s0  ;;  %p1387_p6 = por %p122_p3, %p121_p11 }
  0x39   : > { %s664_s4 = sshll.u32 %s166_s5, 6  ;;  %s745_s27 = sshll.u32 %s1155_s21, 5 }
  0x3a   : > { %s175_s23 = sadd.s32 %s1159_s22, %s745_s27  ;;  %s170_s29 = scalar_lea.vmem [#allocation6], %s664_s4 }
  0x3b   : > { %s667_s30 = sshll.u32 %s175_s23, 2  ;;  %s180_s15 = sshll.u32 %s170_s29, 4  ;;  %s181_s15 = int_to_ptr.vmem [resolvable:$true] %s180_s15 }
  0x3c   : > { %s177_s18 = scalar_lea.hbm %s1535_s1, %s667_s30  ;;  %p797_p0 = pnand %p804_p8, %p1342_p5 }
  0x3d   : > { %s178_s19 = sshll.u32 %s177_s18, 4  ;;  %s167_s26 = scalar_lea.sflag [#allocation7], %s166_s5  ;;  %s179_s19 = int_to_ptr.hbm [resolvable:$true] %s178_s19 }
  0x3e   : > { %s1574_s8 = smov 4   ;;  %s1575_s0 = smov 64  }
  0x3f   : > { %s1576_s17 = smov 128   ;;  %192 = sbr.rel (%p1325_p12) target bundleno = 338 (0x152), region = 28 }
  0x40   : > { %799 = dma.hbm_to_vmem [thread:$0]  (!%p797_p0), %s179_s19, 1024, %s181_s15, %s167_s26, %s1576_s17, %s1575_s0, %s1574_s8  }
  0x41   : > { %s194_s23 = sand.u32 (!%p1325_p12), 1, %s1135_s16  }
  0x42   : > { %s669_s27 = sshll.u32 (!%p1325_p12), %s194_s23, 6  ;;  %s195_s28 = scalar_lea.sflag (!%p1325_p12), [#allocation4], %s194_s23 }
  0x43   : > { %s1406_s4 = scalar_lea.vmem (!%p1325_p12), [#allocation3], %s669_s27 }
  0x44   : > { %1094 = dma.done.wait (%p1305_p7), %s195_s28, 1024  }
  0x45   : > { %1096 = vsyncadd (%p1305_p7), %s195_s28, 4294966272  ;;  %s204_s7 = sand.u32 1, %s1123_s13  }
  0x46   : > { %s670_s5 = sshll.u32 %s204_s7, 6  ;;  %s205_s0 = scalar_lea.sflag [#allocation7], %s204_s7 }
  0x47   : > { %s1413_s17 = scalar_lea.vmem [#allocation6], %s670_s5 }
  0x48   : > { %1098 = dma.done.wait (%p1348_p9), %s205_s0, 1024  }
  0x49   : > { %1100 = vsyncadd (%p1348_p9), %s205_s0, 4294966272  ;;  %s232_s2 = sand.u32 1, %s1111_s10   ;;  %s1577_s6 = sld [smem:[#allocation13_spill]] }
  0x4a   : > { %s671_s30 = sshll.u32 %s232_s2, 7 }
  0x4b   : > { %s1422_s29 = scalar_lea.vmem [#allocation8], %s671_s30 }
  0x4f   : > { %p672_p7 = scmp.ne.s32.totalorder %s1577_s6, 0 }
  0x51   : > { %241 = sbr.rel (%p672_p7) target bundleno = 103 (0x67), region = 40 }
  0x56   : > { %v1172_v0 = vmov 0.0  }
  0x57   : > { %242 = vst [vmem:[#allocation2 + $0x30] sm:$0xff] %v1172_v0 }
  0x58   : > { %243 = vst [vmem:[#allocation2] sm:$0xff] %v1172_v0 }
  0x59   : > { %244 = vst [vmem:[#allocation2 + $0x58] sm:$0xff] %v1172_v0 }
  0x5a   : > { %245 = vst [vmem:[#allocation2 + $0x18] sm:$0xff] %v1172_v0 }
  0x5b   : > { %246 = vst [vmem:[#allocation2 + $0x50] sm:$0xff] %v1172_v0 }
  0x5c   : > { %247 = vst [vmem:[#allocation2 + $0x68] sm:$0xff] %v1172_v0 }
  0x5d   : > { %248 = vst [vmem:[#allocation2 + $0x8] sm:$0xff] %v1172_v0 }
  0x5e   : > { %249 = vst [vmem:[#allocation2 + $0x48] sm:$0xff] %v1172_v0 }
  0x5f   : > { %250 = vst [vmem:[#allocation2 + $0x40] sm:$0xff] %v1172_v0 }
  0x60   : > { %251 = vst [vmem:[#allocation2 + $0x20] sm:$0xff] %v1172_v0 }
  0x61   : > { %252 = vst [vmem:[#allocation2 + $0x10] sm:$0xff] %v1172_v0 }
  0x62   : > { %253 = vst [vmem:[#allocation2 + $0x38] sm:$0xff] %v1172_v0 }
  0x63   : > { %254 = vst [vmem:[#allocation2 + $0x60] sm:$0xff] %v1172_v0 }
  0x64   : > { %255 = vst [vmem:[#allocation2 + $0x70] sm:$0xff] %v1172_v0 }
  0x65   : > { %256 = vst [vmem:[#allocation2 + $0x78] sm:$0xff] %v1172_v0 }
  0x66   : > { %257 = vst [vmem:[#allocation2 + $0x28] sm:$0xff] %v1172_v0 }
  0x67 PF: > { %v761_v1 = vld [vmem:[%s1413_s17 + $0x38] sm:$0xff]  ;;  %v760_v2 = vld [vmem:[%s1413_s17 + $0x30] sm:$0xff]  ;;  %v759_v3 = vld [vmem:[%s1413_s17 + $0x28] sm:$0xff]  ;;  %s1578_s25 = sld [smem:[#allocation13_spill]] }
  0x68   : > { %402 = vmatpush.bf16.msra.mxu0 %v761_v1  ;;  %763 = vmatpush.bf16.msra.mxu1 %v761_v1  ;;  %v758_v4 = vld [vmem:[%s1413_s17 + $0x20] sm:$0xff]  ;;  %v757_v5 = vld [vmem:[%s1413_s17 + $0x18] sm:$0xff]  ;;  %v756_v6 = vld [vmem:[%s1413_s17 + $0x10] sm:$0xff] }
  0x69   : > { %764 = vmatpush.bf16.msra.mxu2 %v761_v1  ;;  %765 = vmatpush.bf16.msra.mxu3 %v761_v1  ;;  %v755_v7 = vld [vmem:[%s1413_s17 + $0x8] sm:$0xff]  ;;  %v754_v8 = vld [vmem:[%s1413_s17] sm:$0xff]  ;;  %v748_v10 = vld [vmem:[%s1406_s4 + $0x10] sm:$0xff] }
  0x6a   : > { %v746_v9 = vld [vmem:[%s1406_s4] sm:$0xff]  ;;  %v752_v12 = vld [vmem:[%s1406_s4 + $0x30] sm:$0xff]  ;;  %v747_v13 = vld [vmem:[%s1406_s4 + $0x8] sm:$0xff] }
  0x6b   : > { %v750_v11 = vld [vmem:[%s1406_s4 + $0x20] sm:$0xff]  ;;  %v749_v14 = vld [vmem:[%s1406_s4 + $0x18] sm:$0xff]  ;;  %v751_v15 = vld [vmem:[%s1406_s4 + $0x28] sm:$0xff] }
  0x6c   : > { %403 = vmatpush.bf16.msra.mxu0 %v760_v2  ;;  %766 = vmatpush.bf16.msra.mxu1 %v760_v2  ;;  %v753_v16 = vld [vmem:[%s1406_s4 + $0x38] sm:$0xff]  ;;  %v258_v17 = vld [vmem:[#allocation2 + $0x30] sm:$0xff]  ;;  %v266_v23 = vld [vmem:[#allocation2 + $0x40] sm:$0xff] }
  0x6d   : > { %767 = vmatpush.bf16.msra.mxu2 %v760_v2  ;;  %768 = vmatpush.bf16.msra.mxu3 %v760_v2  ;;  %v262_v18 = vld [vmem:[#allocation2 + $0x50] sm:$0xff]  ;;  %v270_v24 = vld [vmem:[#allocation2 + $0x60] sm:$0xff]  ;;  %v263_v26 = vld [vmem:[#allocation2 + $0x68] sm:$0xff]  ;;  %p737_p8 = scmp.ne.s32.totalorder %s1578_s25, 1 }
  0x6e   : > { %v259_v25 = vld [vmem:[#allocation2] sm:$0xff]  ;;  %v271_v36 = vld [vmem:[#allocation2 + $0x70] sm:$0xff]  ;;  %v260_v37 = vld [vmem:[#allocation2 + $0x58] sm:$0xff] }
  0x6f   : > { %v267_v35 = vld [vmem:[#allocation2 + $0x20] sm:$0xff]  ;;  %v264_v38 = vld [vmem:[#allocation2 + $0x8] sm:$0xff]  ;;  %v268_v47 = vld [vmem:[#allocation2 + $0x10] sm:$0xff] }
  0x70   : > { %404 = vmatpush.bf16.msra.mxu0 %v759_v3  ;;  %769 = vmatpush.bf16.msra.mxu1 %v759_v3  ;;  %v272_v48 = vld [vmem:[#allocation2 + $0x78] sm:$0xff]  ;;  %v265_v50 = vld [vmem:[#allocation2 + $0x48] sm:$0xff] }
  0x71   : > { %770 = vmatpush.bf16.msra.mxu2 %v759_v3  ;;  %771 = vmatpush.bf16.msra.mxu3 %v759_v3  ;;  %v261_v49 = vld [vmem:[#allocation2 + $0x18] sm:$0xff]  ;;  %v273_v60 = vld [vmem:[#allocation2 + $0x28] sm:$0xff] }
  0x72   : > { %v269_v59 = vld [vmem:[#allocation2 + $0x38] sm:$0xff] }
  0x74   : > { %405 = vmatpush.bf16.msra.mxu0 %v758_v4  ;;  %772 = vmatpush.bf16.msra.mxu1 %v758_v4 }
  0x75   : > { %773 = vmatpush.bf16.msra.mxu2 %v758_v4  ;;  %774 = vmatpush.bf16.msra.mxu3 %v758_v4 }
  0x78   : > { %406 = vmatpush.bf16.msra.mxu0 %v757_v5  ;;  %775 = vmatpush.bf16.msra.mxu1 %v757_v5 }
  0x79   : > { %776 = vmatpush.bf16.msra.mxu2 %v757_v5  ;;  %777 = vmatpush.bf16.msra.mxu3 %v757_v5 }
  0x7c   : > { %407 = vmatpush.bf16.msra.mxu0 %v756_v6  ;;  %778 = vmatpush.bf16.msra.mxu1 %v756_v6 }
  0x7d   : > { %779 = vmatpush.bf16.msra.mxu2 %v756_v6  ;;  %780 = vmatpush.bf16.msra.mxu3 %v756_v6 }
  0x80   : > { %408 = vmatpush.bf16.msra.mxu0 %v755_v7  ;;  %781 = vmatpush.bf16.msra.mxu1 %v755_v7 }
  0x81   : > { %782 = vmatpush.bf16.msra.mxu2 %v755_v7  ;;  %783 = vmatpush.bf16.msra.mxu3 %v755_v7 }
  0x84   : > { %409 = vmatpush.bf16.msra.mxu0 %v754_v8  ;;  %784 = vmatpush.bf16.msra.mxu1 %v754_v8 }
  0x85   : > { %785 = vmatpush.bf16.msra.mxu2 %v754_v8  ;;  %786 = vmatpush.bf16.msra.mxu3 %v754_v8 }
  0x87   : > { %410 = vmatmul.bf16.vlgmr.msra.gmra.mxu0 %v746_v9  ;;  %420 = vmatmul.bf16.vlgmr.msra.gmra.mxu1 %v748_v10 }
  0x88   : > { %430 = vmatmul.bf16.vlgmr.msra.gmra.mxu2 %v750_v11  ;;  %440 = vmatmul.bf16.vlgmr.msra.gmra.mxu3 %v752_v12 }
  0x97   : > { %415 = vmatmul.bf16.gmra.mxu0 %v747_v13  ;;  %425 = vmatmul.bf16.gmra.mxu1 %v749_v14 }
  0x98   : > { %435 = vmatmul.bf16.gmra.mxu2 %v751_v15  ;;  %445 = vmatmul.bf16.gmra.mxu3 %v753_v16 }
 0x104   : > { %v411_v19 = vpop.f32.mrf.mxu0  ;;  %v421_v20 = vpop.f32.mrf.mxu1 }
 0x105   : > { %v451_v21 = vadd.f32 %v411_v19, %v258_v17  ;;  %v455_v22 = vadd.f32 %v421_v20, %v262_v18 }
 0x107   : > { %467 = vst [vmem:[#allocation2 + $0x30] sm:$0xff] %v451_v21 }
 0x108   : > { %471 = vst [vmem:[#allocation2 + $0x50] sm:$0xff] %v455_v22 }
 0x10b   : > { %v431_v27 = vpop.f32.mrf.mxu2  ;;  %v441_v28 = vpop.f32.mrf.mxu3 }
 0x10c   : > { %v459_v29 = vadd.f32 %v431_v27, %v266_v23  ;;  %v463_v30 = vadd.f32 %v441_v28, %v270_v24  ;;  %v413_v31 = vpop.f32.mrf.mxu0  ;;  %v423_v32 = vpop.f32.mrf.mxu1 }
 0x10d   : > { %v452_v33 = vadd.f32 %v413_v31, %v259_v25  ;;  %v456_v34 = vadd.f32 %v423_v32, %v263_v26 }
 0x10e   : > { %475 = vst [vmem:[#allocation2 + $0x40] sm:$0xff] %v459_v29 }
 0x10f   : > { %479 = vst [vmem:[#allocation2 + $0x60] sm:$0xff] %v463_v30 }
 0x110   : > { %468 = vst [vmem:[#allocation2] sm:$0xff] %v452_v33 }
 0x111   : > { %472 = vst [vmem:[#allocation2 + $0x68] sm:$0xff] %v456_v34 }
 0x113   : > { %v433_v39 = vpop.f32.mrf.mxu2  ;;  %v443_v40 = vpop.f32.mrf.mxu3 }
 0x114   : > { %v460_v41 = vadd.f32 %v433_v39, %v267_v35  ;;  %v464_v42 = vadd.f32 %v443_v40, %v271_v36  ;;  %v416_v43 = vpop.f32.mrf.mxu0  ;;  %v426_v44 = vpop.f32.mrf.mxu1 }
 0x115   : > { %v453_v45 = vadd.f32 %v416_v43, %v260_v37  ;;  %v457_v46 = vadd.f32 %v426_v44, %v264_v38 }
 0x116   : > { %476 = vst [vmem:[#allocation2 + $0x20] sm:$0xff] %v460_v41 }
 0x117   : > { %480 = vst [vmem:[#allocation2 + $0x70] sm:$0xff] %v464_v42 }
 0x118   : > { %469 = vst [vmem:[#allocation2 + $0x58] sm:$0xff] %v453_v45 }
 0x119   : > { %473 = vst [vmem:[#allocation2 + $0x8] sm:$0xff] %v457_v46 }
 0x11b   : > { %v436_v51 = vpop.f32.mrf.mxu2  ;;  %v446_v52 = vpop.f32.mrf.mxu3 }
 0x11c   : > { %v461_v53 = vadd.f32 %v436_v51, %v268_v47  ;;  %v465_v54 = vadd.f32 %v446_v52, %v272_v48  ;;  %v418_v55 = vpop.f32.mrf.mxu0  ;;  %v428_v56 = vpop.f32.mrf.mxu1 }
 0x11d   : > { %v454_v57 = vadd.f32 %v418_v55, %v261_v49  ;;  %v458_v58 = vadd.f32 %v428_v56, %v265_v50 }
 0x11e   : > { %477 = vst [vmem:[#allocation2 + $0x10] sm:$0xff] %v461_v53 }
 0x11f   : > { %481 = vst [vmem:[#allocation2 + $0x78] sm:$0xff] %v465_v54 }
 0x120   : > { %470 = vst [vmem:[#allocation2 + $0x18] sm:$0xff] %v454_v57 }
 0x121   : > { %474 = vst [vmem:[#allocation2 + $0x48] sm:$0xff] %v458_v58 }
 0x123   : > { %v438_v61 = vpop.f32.mrf.mxu2  ;;  %v448_v62 = vpop.f32.mrf.mxu3  ;;  %486 = sbr.rel (%p737_p8) target bundleno = 313 (0x139), region = 44 }
 0x124   : > { %v462_v63 = vadd.f32 %v438_v61, %v269_v59  ;;  %v466_v0 = vadd.f32 %v448_v62, %v273_v60 }
 0x126   : > { %478 = vst [vmem:[#allocation2 + $0x38] sm:$0xff] %v462_v63 }
 0x127   : > { %482 = vst [vmem:[#allocation2 + $0x28] sm:$0xff] %v466_v0 }
 0x128   : > { %v487_v1 = vld [vmem:[#allocation2 + $0x30] sm:$0xff]  ;;  %v488_v2 = vld [vmem:[#allocation2] sm:$0xff]  ;;  %v489_v3 = vld [vmem:[#allocation2 + $0x58] sm:$0xff] }
 0x129   : > { %503 = vst [vmem:[%s1422_s29] sm:$0xff] %v487_v1  ;;  %v490_v4 = vld [vmem:[#allocation2 + $0x18] sm:$0xff]  ;;  %v491_v5 = vld [vmem:[#allocation2 + $0x50] sm:$0xff]  ;;  %v492_v6 = vld [vmem:[#allocation2 + $0x68] sm:$0xff] }
 0x12a   : > { %504 = vst [vmem:[%s1422_s29 + $0x8] sm:$0xff] %v488_v2  ;;  %v493_v7 = vld [vmem:[#allocation2 + $0x8] sm:$0xff]  ;;  %v495_v9 = vld [vmem:[#allocation2 + $0x40] sm:$0xff]  ;;  %v497_v11 = vld [vmem:[#allocation2 + $0x10] sm:$0xff] }
 0x12b   : > { %505 = vst [vmem:[%s1422_s29 + $0x10] sm:$0xff] %v489_v3  ;;  %v494_v8 = vld [vmem:[#allocation2 + $0x48] sm:$0xff]  ;;  %v496_v10 = vld [vmem:[#allocation2 + $0x20] sm:$0xff]  ;;  %v500_v14 = vld [vmem:[#allocation2 + $0x70] sm:$0xff] }
 0x12c   : > { %506 = vst [vmem:[%s1422_s29 + $0x18] sm:$0xff] %v490_v4  ;;  %v499_v13 = vld [vmem:[#allocation2 + $0x60] sm:$0xff]  ;;  %v501_v15 = vld [vmem:[#allocation2 + $0x78] sm:$0xff] }
 0x12d   : > { %507 = vst [vmem:[%s1422_s29 + $0x20] sm:$0xff] %v491_v5  ;;  %v498_v12 = vld [vmem:[#allocation2 + $0x38] sm:$0xff] }
 0x12e   : > { %508 = vst [vmem:[%s1422_s29 + $0x28] sm:$0xff] %v492_v6  ;;  %v502_v16 = vld [vmem:[#allocation2 + $0x28] sm:$0xff] }
 0x12f   : > { %509 = vst [vmem:[%s1422_s29 + $0x30] sm:$0xff] %v493_v7 }
 0x130   : > { %510 = vst [vmem:[%s1422_s29 + $0x38] sm:$0xff] %v494_v8 }
 0x131   : > { %511 = vst [vmem:[%s1422_s29 + $0x40] sm:$0xff] %v495_v9 }
 0x132   : > { %512 = vst [vmem:[%s1422_s29 + $0x48] sm:$0xff] %v496_v10 }
 0x133   : > { %513 = vst [vmem:[%s1422_s29 + $0x50] sm:$0xff] %v497_v11 }
 0x134   : > { %514 = vst [vmem:[%s1422_s29 + $0x58] sm:$0xff] %v498_v12 }
 0x135   : > { %515 = vst [vmem:[%s1422_s29 + $0x60] sm:$0xff] %v499_v13 }
 0x136   : > { %516 = vst [vmem:[%s1422_s29 + $0x68] sm:$0xff] %v500_v14 }
 0x137   : > { %517 = vst [vmem:[%s1422_s29 + $0x70] sm:$0xff] %v501_v15 }
 0x138   : > { %518 = vst [vmem:[%s1422_s29 + $0x78] sm:$0xff] %v502_v16 }
 0x139 PF: > { %s1579_s15 = sld [smem:[#allocation15_spill]]  ;;  %s534_s8 = sshll.u32 %s1422_s29, 4  ;;  %s535_s8 = int_to_ptr.vmem [resolvable:$true] %s534_s8 }
 0x13a   : > { %s1580_s12 = sld [smem:[#allocation14_spill]]  ;;  %s520_s0 = scalar_lea.sflag [#allocation5], %s232_s2 }
 0x13b   : > { %s1582_s4 = sld [smem:[#allocation24_spill]] }
 0x13f   : > { %s762_s19 = sshll.u32 %s1579_s15, 5 }
 0x140   : > { %s531_s26 = sadd.s32 %s1580_s12, %s762_s19 }
 0x141   : > { %s741_s23 = sshll.u32 %s531_s26, 3  ;;  %s1021_s29 = scalar_lea.hbm %s1582_s4, 512 }
 0x142   : > { %s533_s7 = scalar_lea.hbm %s1582_s4, %s741_s23 }
 0x143   : > { %s536_s5 = sshll.u32 %s533_s7, 4  ;;  %s537_s5 = int_to_ptr.hbm [resolvable:$true] %s536_s5 }
 0x144   : > { %s1015_s17 = sshra.s32 %s537_s5, 4  ;;  %s1016_s17 = int_to_ptr.hbm [resolvable:$true] %s1015_s17 }
 0x145   : > { %s1017_s30 = scalar_lea.hbm %s1016_s17, 128  ;;  %p1022_p2 = scmp.lt.s32.totalorder %s1016_s17, %s1582_s4 }
 0x146   : > { %p1018_p12 = scmp.ne.s32.totalorder %s1016_s17, %s1017_s30  ;;  %p1023_p10 = scmp.lt.s32.totalorder %s1021_s29, %s1017_s30 }
 0x148   : > { %p1019_p5 = pnand %p1018_p12, %p1364_p4  ;;  %p1024_p11 = por %p1023_p10, %p1022_p2 }
 0x14a   : > { %p1020_p9 = pneg %p1019_p5 }
 0x14c   : > { %p1025_p13 = pnand %p1024_p11, %p1020_p9 }
 0x14e   : > { %1028 = shalt.err (!%p1025_p13)
}
 0x14f   : > { %s1173_s2 = smov 128   ;;  %s1174_s19 = smov 256  }
 0x150   : > { %s1175_s26 = smov 8  }
 0x151   : > { %791 = dma.vmem_to_hbm [thread:$0]  (%p1364_p4), %s535_s8, 2048, %s537_s5, %s520_s0, %s1173_s2, %s1174_s19, %s1175_s26  }
 0x152 PF: > { %p805_p1 = scmp.ge.s32.totalorder %s1167_s24, 2  ;;  %s551_s23 = sand.u32 1, %s1107_s9  }
 0x153   : > { %s552_s27 = scalar_lea.sflag [#allocation5], %s551_s23 }
 0x154   : > { %p801_p3 = pnand %p805_p1, %p1387_p6 }
 0x156   : > { %p802_p0 = pneg %p801_p3 }
 0x158   : > { %1102 = dma.done.wait (%p802_p0), %s552_s27, 2048  }
 0x159   : > { %1104 = vsyncadd (%p802_p0), %s552_s27, 4294965248  ;;  %s21_s24 = sadd.s32 1, %s1167_s24   ;;  %s1584_s18 = sld [smem:[#allocation21_spill]] }
 0x15a   : > { %p1481_p7 = scmp.ge.s32.totalorder %s21_s24, 10   ;;  %s1585_s8 = sld [smem:[#allocation12_spill]] }
 0x15b   : > { %s1586_s17 = sld [smem:[#allocation22_spill]]  ;;  %s1591_s9 = smov %s1111_s10 }
 0x15c   : > { %s1587_s3 = sld [smem:[#allocation16_spill]]  ;;  %s1592_s10 = smov %s1115_s11 }
 0x15d   : > { %s1588_s7 = sld [smem:[#allocation17_spill]]  ;;  %s1593_s11 = smov %s1385_s20 }
 0x15e   : > { %s1589_s5 = sld [smem:[#allocation18_spill]]  ;;  %s1594_s12 = smov %s1123_s13 }
 0x15f   : > { %s1590_s23 = sld [smem:[#allocation20_spill]]  ;;  %s1595_s13 = smov %s1127_s14 }
 0x160   : > { %s1596_s14 = smov %s1584_s18  ;;  %s1597_s15 = smov %s1135_s16 }
 0x161   : > { %s1598_s16 = smov %s1585_s8  ;;  %s1599_s18 = smov %s1155_s21 }
 0x162   : > { %s1600_s19 = smov %s1159_s22  ;;  %s1601_s20 = smov %s1587_s3 }
 0x163   : > { %s1602_s21 = smov %s1588_s7  ;;  %20 = sbr.rel (!%p1481_p7) target bundleno = 16 (0x10), region = 94 }
 0x164   : > { %s1603_s22 = smov %s1589_s5 }
 0x168   :  { %558 = vsyncpa [#allocation4], 1 }
 0x169   :  { %560 = vsyncpa [#allocation4 + $0x1], 1 }
 0x16a   :  { %561 = vsyncpa [#allocation7], 1 }
 0x16b   :  { %563 = vsyncpa [#allocation7 + $0x1], 1 }
 0x16c   :  { %564 = vsyncpa [#allocation5], 1 }
 0x16d   :  { %566 = vsyncpa [#allocation5 + $0x1], 1 }

</bundles_post_ra>
